<compile_context>
chip_gen: v7x
topology: tpu7x:2x2x1
jax: 0.10.0
libtpu: 0.0.40
codegen_flags: <defaults>
</compile_context>

<pallas_src>
import functools

import jax
import jax.numpy as jnp
from jax.experimental import pallas as pl
from jax.experimental.pallas import tpu as pltpu


def _round_up(x, m):
    return ((x + m - 1) // m) * m


def _double_conv_kernel(x_ref, w1_ref, s1_ref, b1_ref, w2_ref, s2_ref, b2_ref,
                        o_ref, *, valid_len):
    """One batch element.

    x_ref : (1, Cin_p, Lp)   compute dtype
    w*_ref: (Cout_p, 3*C*_p) compute dtype (tap-major along K)
    s*/b* : (Cout_p, 1)      f32 (folded BatchNorm scale / bias)
    o_ref : (1, Cout_p, Lp)
    """

    def conv3_bn_relu(z, w_ref, s_ref, b_ref):
        # z: (C, Lp), already zero for lanes >= valid_len.
        c, lp = z.shape
        lane_in = jax.lax.broadcasted_iota(jnp.int32, (c, lp), 1)
        zero = jnp.zeros_like(z)
        # "same" padding: tap at l-1 / l+1 via lane-axis rolls + boundary masks.
        z_prev = jnp.where(lane_in == 0, zero, pltpu.roll(z, shift=1, axis=1))
        z_next = jnp.where(lane_in == lp - 1, zero,
                           pltpu.roll(z, shift=lp - 1, axis=1))
        zs = jnp.concatenate([z_prev, z, z_next], axis=0)           # (3C, Lp)
        # Single im2col matmul per layer, f32 accumulation on the MXU.
        y = jnp.dot(w_ref[...], zs, preferred_element_type=jnp.float32)
        y = y * s_ref[...] + b_ref[...]                             # folded BN (f32)
        y = jnp.maximum(y, 0.0)                                     # ReLU
        if valid_len < lp:
            # Keep padded lanes at zero so they act as conv zero-padding
            # for the next layer.
            lane_out = jax.lax.broadcasted_iota(jnp.int32, y.shape, 1)
            y = jnp.where(lane_out < valid_len, y, 0.0)
        return y

    x = x_ref[0]                                                    # (Cin_p, Lp)
    h = conv3_bn_relu(x, w1_ref, s1_ref, b1_ref).astype(x.dtype)    # back to compute dtype
    y = conv3_bn_relu(h, w2_ref, s2_ref, b2_ref)
    o_ref[0] = y.astype(o_ref.dtype)


def double_conv_pallas(x_ncl, w1, g1, beta1, mean1, var1,
                       w2, g2, beta2, mean2, var2,
                       eps=1e-5, compute_dtype=None):
    """(Conv1d(k=3,p=1,bias=False) -> BN(eval) -> ReLU) x 2.

    x_ncl: (N, C_in, L). Returns (N, C_out, L), matching the PyTorch module.
    compute_dtype: dtype fed to the MXU (default: x dtype; bf16 recommended).
    """
    N, C_in, L = x_ncl.shape
    C_out = w1.shape[0]
    out_dtype = x_ncl.dtype
    if compute_dtype is None:
        compute_dtype = x_ncl.dtype

    # Fold BatchNorm (inference mode) into per-channel scale / bias, in f32.
    s1 = g1.astype(jnp.float32) / jnp.sqrt(var1.astype(jnp.float32) + eps)
    b1 = beta1.astype(jnp.float32) - mean1.astype(jnp.float32) * s1
    s2 = g2.astype(jnp.float32) / jnp.sqrt(var2.astype(jnp.float32) + eps)
    b2 = beta2.astype(jnp.float32) - mean2.astype(jnp.float32) * s2

    # Pad channels to sublane (8) and L to lane (128) multiples; stay in NCL so
    # L is on the lane axis (lane-dense stores, no wrapper transposes).
    Cip = _round_up(C_in, 8)
    Cop = _round_up(C_out, 8)
    Lp = _round_up(L, 128)

    x_p = jnp.pad(x_ncl, ((0, 0), (0, Cip - C_in), (0, Lp - L))).astype(compute_dtype)

    def prep_w(w, cin, cin_p):
        # (C_out, cin, 3) -> (Cop, 3*cin_p), tap-major along K to match the
        # in-kernel concat order [z[l-1]; z[l]; z[l+1]].
        w_p = jnp.pad(w, ((0, Cop - C_out), (0, cin_p - cin), (0, 0)))
        return jnp.concatenate([w_p[:, :, 0], w_p[:, :, 1], w_p[:, :, 2]],
                               axis=1).astype(compute_dtype)

    w1k = prep_w(w1, C_in, Cip)      # (Cop, 3*Cip)
    w2k = prep_w(w2, C_out, Cop)     # (Cop, 3*Cop)

    def prep_sb(v):
        return jnp.pad(v, (0, Cop - C_out)).reshape(Cop, 1).astype(jnp.float32)

    s1p, b1p, s2p, b2p = prep_sb(s1), prep_sb(b1), prep_sb(s2), prep_sb(b2)

    cbytes = jnp.dtype(compute_dtype).itemsize
    obytes = jnp.dtype(out_dtype).itemsize
    # Per grid step: double-buffered in/out blocks + weight/scale blocks + f32
    # in-kernel temporaries (taps, im2col slab, conv outputs).
    per_step = (2 * (Cip * Lp * cbytes + Cop * Lp * obytes)
                + 2 * 3 * Cop * (Cip + Cop) * cbytes
                + (3 * Cip + 3 * Cop + 6 * Cop) * Lp * 4)
    vmem_limit = int(min(56 * 2 ** 20, max(32 * 2 ** 20, 2 * per_step)))

    flops = int(2 * N * Lp * (3 * Cip * Cop + 3 * Cop * Cop))
    bytes_accessed = int(x_p.size * cbytes + N * Cop * Lp * obytes
                         + (w1k.size + w2k.size) * cbytes + 4 * Cop * 4)

    kernel = functools.partial(_double_conv_kernel, valid_len=L)

    out_p = pl.pallas_call(
        kernel,
        out_shape=jax.ShapeDtypeStruct((N, Cop, Lp), out_dtype),
        grid=(N,),
        in_specs=[
            pl.BlockSpec((1, Cip, Lp), lambda n: (n, 0, 0)),
            pl.BlockSpec((Cop, 3 * Cip), lambda n: (0, 0)),
            pl.BlockSpec((Cop, 1), lambda n: (0, 0)),
            pl.BlockSpec((Cop, 1), lambda n: (0, 0)),
            pl.BlockSpec((Cop, 3 * Cop), lambda n: (0, 0)),
            pl.BlockSpec((Cop, 1), lambda n: (0, 0)),
            pl.BlockSpec((Cop, 1), lambda n: (0, 0)),
        ],
        out_specs=pl.BlockSpec((1, Cop, Lp), lambda n: (n, 0, 0)),
        compiler_params=pltpu.CompilerParams(
            dimension_semantics=("parallel",),
            vmem_limit_bytes=vmem_limit),
        cost_estimate=pl.CostEstimate(
            flops=flops, transcendentals=0, bytes_accessed=bytes_accessed),
    )(x_p, w1k, s1p, b1p, w2k, s2p, b2p)

    return out_p[:, :C_out, :L]


def _reference(x_ncl, w1, g1, beta1, mean1, var1, w2, g2, beta2, mean2, var2, eps=1e-5):
    """Pure-JAX reference matching torch Conv1d / BN(eval) / ReLU semantics."""
    def conv_bn_relu(x, w, g, beta, mean, var):
        y = jax.lax.conv_general_dilated(
            x, w, window_strides=(1,), padding=((1, 1),),
            dimension_numbers=("NCH", "OIH", "NCH"))
        s = g / jnp.sqrt(var + eps)
        b = beta - mean * s
        y = y * s[None, :, None] + b[None, :, None]
        return jnp.maximum(y, 0.0)
    h = conv_bn_relu(x_ncl, w1, g1, beta1, mean1, var1)
    return conv_bn_relu(h, w2, g2, beta2, mean2, var2)


if __name__ == "__main__":
    N, C_in, C_out, L = 2, 4, 8, 16
    key = jax.random.PRNGKey(0)
    ks = jax.random.split(key, 11)

    x = jax.random.normal(ks[0], (N, C_in, L), jnp.float32)

    # Conv weights (no bias), deterministic init.
    w1 = jax.random.normal(ks[1], (C_out, C_in, 3), jnp.float32) * 0.2
    w2 = jax.random.normal(ks[2], (C_out, C_out, 3), jnp.float32) * 0.2

    # BatchNorm params / running stats, deterministic and non-trivial.
    g1 = 1.0 + 0.1 * jax.random.normal(ks[3], (C_out,), jnp.float32)
    beta1 = 0.1 * jax.random.normal(ks[4], (C_out,), jnp.float32)
    mean1 = 0.1 * jax.random.normal(ks[5], (C_out,), jnp.float32)
    var1 = jnp.abs(jax.random.normal(ks[6], (C_out,), jnp.float32)) + 0.5
    g2 = 1.0 + 0.1 * jax.random.normal(ks[7], (C_out,), jnp.float32)
    beta2 = 0.1 * jax.random.normal(ks[8], (C_out,), jnp.float32)
    mean2 = 0.1 * jax.random.normal(ks[9], (C_out,), jnp.float32)
    var2 = jnp.abs(jax.random.normal(ks[10], (C_out,), jnp.float32)) + 0.5

    ref = _reference(x, w1, g1, beta1, mean1, var1, w2, g2, beta2, mean2, var2)

    # f32 compute path (matches the f32 reference tightly).
    out = jax.block_until_ready(
        double_conv_pallas(x, w1, g1, beta1, mean1, var1,
                           w2, g2, beta2, mean2, var2))
    assert out.shape == (N, C_out, L), out.shape
    assert jnp.allclose(out, ref, atol=1e-5, rtol=1e-5), \
        float(jnp.max(jnp.abs(out - ref)))

    # bf16 MXU path (f32 accumulation) -- same kernel, looser tolerance.
    out_bf16 = jax.block_until_ready(
        double_conv_pallas(x, w1, g1, beta1, mean1, var1,
                           w2, g2, beta2, mean2, var2,
                           compute_dtype=jnp.bfloat16))
    assert out_bf16.shape == (N, C_out, L), out_bf16.shape
    assert float(jnp.max(jnp.abs(out_bf16 - ref))) < 0.25, \
        float(jnp.max(jnp.abs(out_bf16 - ref)))

    print("KERNEL_OK")
</pallas_src>

<mosaic_0001>
module attributes {stable_mosaic.version = 11 : i64} {
  func.func @_double_conv_kernel(%arg0: i32, %arg1: memref<1x8x128xf32, #tpu.memory_space<vmem>>, %arg2: memref<8x24xf32, #tpu.memory_space<vmem>>, %arg3: memref<8x1xf32, #tpu.memory_space<vmem>>, %arg4: memref<8x1xf32, #tpu.memory_space<vmem>>, %arg5: memref<8x24xf32, #tpu.memory_space<vmem>>, %arg6: memref<8x1xf32, #tpu.memory_space<vmem>>, %arg7: memref<8x1xf32, #tpu.memory_space<vmem>>, %arg8: memref<1x8x128xf32, #tpu.memory_space<vmem>>) attributes {dimension_semantics = [#tpu.dimension_semantics<parallel>], iteration_bounds = array<i64: 2>, scalar_prefetch = 0 : i64, scratch_operands = 0 : i64, tpu.core_type = #tpu.core_type<tc>, window_params = [{transform_indices = @transform_0, window_bounds = array<i64: 1, 8, 128>}, {pipeline_mode = #tpu.pipeline_mode<synchronous>, transform_indices = @transform_1, window_bounds = array<i64: 8, 24>}, {pipeline_mode = #tpu.pipeline_mode<synchronous>, transform_indices = @transform_2, window_bounds = array<i64: 8, 1>}, {pipeline_mode = #tpu.pipeline_mode<synchronous>, transform_indices = @transform_3, window_bounds = array<i64: 8, 1>}, {pipeline_mode = #tpu.pipeline_mode<synchronous>, transform_indices = @transform_4, window_bounds = array<i64: 8, 24>}, {pipeline_mode = #tpu.pipeline_mode<synchronous>, transform_indices = @transform_5, window_bounds = array<i64: 8, 1>}, {pipeline_mode = #tpu.pipeline_mode<synchronous>, transform_indices = @transform_6, window_bounds = array<i64: 8, 1>}, {transform_indices = @transform_7, window_bounds = array<i64: 1, 8, 128>}]} {
    %c0 = arith.constant 0 : index
    %c0_0 = arith.constant 0 : index
    %c0_1 = arith.constant 0 : index
    %0 = vector.load %arg1[%c0, %c0_0, %c0_1] : memref<1x8x128xf32, #tpu.memory_space<vmem>>, vector<1x8x128xf32>
    %1 = vector.shape_cast %0 : vector<1x8x128xf32> to vector<8x128xf32>
    %2 = tpu.iota {dimensions = array<i32: 1>} : vector<8x128xi32>
    %cst = arith.constant 0.000000e+00 : f32
    %3 = vector.broadcast %cst : f32 to vector<8x128xf32>
    %c0_i32 = arith.constant 0 : i32
    %4 = vector.broadcast %c0_i32 : i32 to vector<8x128xi32>
    %5 = arith.cmpi eq, %2, %4 : vector<8x128xi32>
    %c1_i32 = arith.constant 1 : i32
    %6 = tpu.dynamic_rotate %1 by %c1_i32 dim 1 : vector<8x128xf32>, i32 -> vector<8x128xf32>
    %7 = arith.select %5, %3, %6 : vector<8x128xi1>, vector<8x128xf32>
    %c127_i32 = arith.constant 127 : i32
    %8 = vector.broadcast %c127_i32 : i32 to vector<8x128xi32>
    %9 = arith.cmpi eq, %2, %8 : vector<8x128xi32>
    %c127_i32_2 = arith.constant 127 : i32
    %10 = tpu.dynamic_rotate %1 by %c127_i32_2 dim 1 : vector<8x128xf32>, i32 -> vector<8x128xf32>
    %11 = arith.select %9, %3, %10 : vector<8x128xi1>, vector<8x128xf32>
    %12 = tpu.concatenate %7, %1, %11 in 0 : vector<8x128xf32>, vector<8x128xf32>, vector<8x128xf32> -> vector<24x128xf32>
    %c0_3 = arith.constant 0 : index
    %c0_4 = arith.constant 0 : index
    %13 = vector.load %arg2[%c0_3, %c0_4] : memref<8x24xf32, #tpu.memory_space<vmem>>, vector<8x24xf32>
    %cst_5 = arith.constant dense<0.000000e+00> : vector<8x128xf32>
    %14 = tpu.matmul %13, %12, %cst_5 {dimension_numbers = #tpu.dot_dimension_numbers<[1], [0], [0], [1], [0, 0, 1, 1], [], []>} : vector<8x24xf32>, vector<24x128xf32>, vector<8x128xf32> -> vector<8x128xf32>
    %c0_6 = arith.constant 0 : index
    %c0_7 = arith.constant 0 : index
    %15 = vector.load %arg3[%c0_6, %c0_7] : memref<8x1xf32, #tpu.memory_space<vmem>>, vector<8x1xf32>
    %16 = vector.broadcast %15 : vector<8x1xf32> to vector<8x128xf32>
    %17 = arith.mulf %14, %16 : vector<8x128xf32>
    %c0_8 = arith.constant 0 : index
    %c0_9 = arith.constant 0 : index
    %18 = vector.load %arg4[%c0_8, %c0_9] : memref<8x1xf32, #tpu.memory_space<vmem>>, vector<8x1xf32>
    %19 = vector.broadcast %18 : vector<8x1xf32> to vector<8x128xf32>
    %20 = arith.addf %17, %19 : vector<8x128xf32>
    %cst_10 = arith.constant 0.000000e+00 : f32
    %21 = vector.broadcast %cst_10 : f32 to vector<8x128xf32>
    %22 = arith.maximumf %20, %21 : vector<8x128xf32>
    %23 = tpu.iota {dimensions = array<i32: 1>} : vector<8x128xi32>
    %c16_i32 = arith.constant 16 : i32
    %24 = vector.broadcast %c16_i32 : i32 to vector<8x128xi32>
    %25 = arith.cmpi slt, %23, %24 : vector<8x128xi32>
    %cst_11 = arith.constant 0.000000e+00 : f32
    %26 = vector.broadcast %cst_11 : f32 to vector<8x128xf32>
    %27 = arith.select %25, %22, %26 : vector<8x128xi1>, vector<8x128xf32>
    %28 = tpu.iota {dimensions = array<i32: 1>} : vector<8x128xi32>
    %cst_12 = arith.constant 0.000000e+00 : f32
    %29 = vector.broadcast %cst_12 : f32 to vector<8x128xf32>
    %c0_i32_13 = arith.constant 0 : i32
    %30 = vector.broadcast %c0_i32_13 : i32 to vector<8x128xi32>
    %31 = arith.cmpi eq, %28, %30 : vector<8x128xi32>
    %c1_i32_14 = arith.constant 1 : i32
    %32 = tpu.dynamic_rotate %27 by %c1_i32_14 dim 1 : vector<8x128xf32>, i32 -> vector<8x128xf32>
    %33 = arith.select %31, %29, %32 : vector<8x128xi1>, vector<8x128xf32>
    %c127_i32_15 = arith.constant 127 : i32
    %34 = vector.broadcast %c127_i32_15 : i32 to vector<8x128xi32>
    %35 = arith.cmpi eq, %28, %34 : vector<8x128xi32>
    %c127_i32_16 = arith.constant 127 : i32
    %36 = tpu.dynamic_rotate %27 by %c127_i32_16 dim 1 : vector<8x128xf32>, i32 -> vector<8x128xf32>
    %37 = arith.select %35, %29, %36 : vector<8x128xi1>, vector<8x128xf32>
    %38 = tpu.concatenate %33, %27, %37 in 0 : vector<8x128xf32>, vector<8x128xf32>, vector<8x128xf32> -> vector<24x128xf32>
    %c0_17 = arith.constant 0 : index
    %c0_18 = arith.constant 0 : index
    %39 = vector.load %arg5[%c0_17, %c0_18] : memref<8x24xf32, #tpu.memory_space<vmem>>, vector<8x24xf32>
    %cst_19 = arith.constant dense<0.000000e+00> : vector<8x128xf32>
    %40 = tpu.matmul %39, %38, %cst_19 {dimension_numbers = #tpu.dot_dimension_numbers<[1], [0], [0], [1], [0, 0, 1, 1], [], []>} : vector<8x24xf32>, vector<24x128xf32>, vector<8x128xf32> -> vector<8x128xf32>
    %c0_20 = arith.constant 0 : index
    %c0_21 = arith.constant 0 : index
    %41 = vector.load %arg6[%c0_20, %c0_21] : memref<8x1xf32, #tpu.memory_space<vmem>>, vector<8x1xf32>
    %42 = vector.broadcast %41 : vector<8x1xf32> to vector<8x128xf32>
    %43 = arith.mulf %40, %42 : vector<8x128xf32>
    %c0_22 = arith.constant 0 : index
    %c0_23 = arith.constant 0 : index
    %44 = vector.load %arg7[%c0_22, %c0_23] : memref<8x1xf32, #tpu.memory_space<vmem>>, vector<8x1xf32>
    %45 = vector.broadcast %44 : vector<8x1xf32> to vector<8x128xf32>
    %46 = arith.addf %43, %45 : vector<8x128xf32>
    %cst_24 = arith.constant 0.000000e+00 : f32
    %47 = vector.broadcast %cst_24 : f32 to vector<8x128xf32>
    %48 = arith.maximumf %46, %47 : vector<8x128xf32>
    %49 = tpu.iota {dimensions = array<i32: 1>} : vector<8x128xi32>
    %c16_i32_25 = arith.constant 16 : i32
    %50 = vector.broadcast %c16_i32_25 : i32 to vector<8x128xi32>
    %51 = arith.cmpi slt, %49, %50 : vector<8x128xi32>
    %cst_26 = arith.constant 0.000000e+00 : f32
    %52 = vector.broadcast %cst_26 : f32 to vector<8x128xf32>
    %53 = arith.select %51, %48, %52 : vector<8x128xi1>, vector<8x128xf32>
    %c0_27 = arith.constant 0 : index
    %c0_28 = arith.constant 0 : index
    %c0_29 = arith.constant 0 : index
    %54 = vector.load %arg8[%c0_27, %c0_28, %c0_29] : memref<1x8x128xf32, #tpu.memory_space<vmem>>, vector<1x8x128xf32>
    %55 = vector.shape_cast %54 : vector<1x8x128xf32> to vector<8x128xf32>
    %56 = vector.shape_cast %53 : vector<8x128xf32> to vector<1x8x128xf32>
    tpu.vector_store %arg8[%c0_27, %c0_28, %c0_29], %56 {strides = array<i32>} : memref<1x8x128xf32, #tpu.memory_space<vmem>>, vector<1x8x128xf32>,
    return
  }
  func.func @transform_0(%arg0: i32) -> (i32, i32, i32) {
    %c0_i32 = arith.constant 0 : i32
    %c0_i32_0 = arith.constant 0 : i32
    %c0_i32_1 = arith.constant 0 : i32
    return %arg0, %c0_i32, %c0_i32_0 : i32, i32, i32
  }
  func.func @transform_1(%arg0: i32) -> (i32, i32) {
    %c0_i32 = arith.constant 0 : i32
    %c0_i32_0 = arith.constant 0 : i32
    %c0_i32_1 = arith.constant 0 : i32
    return %c0_i32, %c0_i32_0 : i32, i32
  }
  func.func @transform_2(%arg0: i32) -> (i32, i32) {
    %c0_i32 = arith.constant 0 : i32
    %c0_i32_0 = arith.constant 0 : i32
    %c0_i32_1 = arith.constant 0 : i32
    return %c0_i32, %c0_i32_0 : i32, i32
  }
  func.func @transform_3(%arg0: i32) -> (i32, i32) {
    %c0_i32 = arith.constant 0 : i32
    %c0_i32_0 = arith.constant 0 : i32
    %c0_i32_1 = arith.constant 0 : i32
    return %c0_i32, %c0_i32_0 : i32, i32
  }
  func.func @transform_4(%arg0: i32) -> (i32, i32) {
    %c0_i32 = arith.constant 0 : i32
    %c0_i32_0 = arith.constant 0 : i32
    %c0_i32_1 = arith.constant 0 : i32
    return %c0_i32, %c0_i32_0 : i32, i32
  }
  func.func @transform_5(%arg0: i32) -> (i32, i32) {
    %c0_i32 = arith.constant 0 : i32
    %c0_i32_0 = arith.constant 0 : i32
    %c0_i32_1 = arith.constant 0 : i32
    return %c0_i32, %c0_i32_0 : i32, i32
  }
  func.func @transform_6(%arg0: i32) -> (i32, i32) {
    %c0_i32 = arith.constant 0 : i32
    %c0_i32_0 = arith.constant 0 : i32
    %c0_i32_1 = arith.constant 0 : i32
    return %c0_i32, %c0_i32_0 : i32, i32
  }
  func.func @transform_7(%arg0: i32) -> (i32, i32, i32) {
    %c0_i32 = arith.constant 0 : i32
    %c0_i32_0 = arith.constant 0 : i32
    %c0_i32_1 = arith.constant 0 : i32
    return %arg0, %c0_i32, %c0_i32_0 : i32, i32, i32
  }
}

</mosaic_0001>

<bundles_post_ra>
// kernel: tpu_custom_call.1
= control target key start
LH: loop header
LB: loop body
LE: loop exit
PB: predicated region body
PF: predicated region fallthrough
CT: control target
= control target key end

     0   :  { %12 = vsyncpa [#allocation3], 0  ;;  %s893_s0 = inlined_call_operand.vmem [shape: f32[2,8,128], index: 0, kind: input, shape index: {}]   ;;  %s894_s1 = inlined_call_operand.vmem [shape: f32[8,24], index: 1, kind: input, shape index: {}]   ;;  %s895_s2 = inlined_call_operand.vmem [shape: f32[8,1], index: 2, kind: input, shape index: {}]   ;;  %s896_s3 = inlined_call_operand.vmem [shape: f32[8,1], index: 3, kind: input, shape index: {}]   ;;  %s897_s4 = inlined_call_operand.vmem [shape: f32[8,24], index: 4, kind: input, shape index: {}]   ;;  %s898_s5 = inlined_call_operand.vmem [shape: f32[8,1], index: 5, kind: input, shape index: {}]   ;;  %s899_s6 = inlined_call_operand.vmem [shape: f32[8,1], index: 6, kind: input, shape index: {}]   ;;  %s900_s7 = inlined_call_operand.hbm [shape: f32[2,8,128], index: 7, kind: output, shape index: {}]  }
   0x1   :  { %14 = vsyncpa [#allocation3 + $0x1], 0  ;;  %s764_s24 = smov 0   ;;  %s766_s25 = smov 0  }
   0x2   :  { %s768_s26 = smov 0   ;;  %s770_s27 = smov 0  }
   0x3 LB: > { %s785_s28 = sadd.s32 4294967295, %s714_s27   ;;  %s547_s29 = sadd.s32 4294967294, %s714_s27   ;;  %s714_s27 = sphi %s770_s27, %s906_s27   ;;  %s710_s26 = sphi %s768_s26, %s905_s26   ;;  %s706_s25 = sphi %s766_s25, %s904_s25   ;;  %s702_s24 = sphi %s764_s24, %s903_s24  }
   0x4   : > { %s789_s30 = sadd.s32 1, %s714_s27   ;;  %s179_s8 = sadd.s32 1, %s710_s26 }
   0x5   : > { %s176_s9 = ssub.s32 %s714_s27, %s789_s30  ;;  %p189_p0 = scmp.ne.s32.totalorder %s710_s26, %s706_s25 }
   0x6   : > { %p177_p1 = scmp.eq.s32.totalorder %s176_s9, 0  ;;  %p190_p2 = scmp.eq.s32.totalorder %s785_s28, 1 }
   0x7   : > { %p195_p3 = scmp.ne.s32.totalorder %s706_s25, %s702_s24  ;;  %p196_p4 = scmp.eq.s32.totalorder %s547_s29, 1 }
   0x8   : > { %s800_s10 = scalar_select %p177_p1, %s710_s26, %s179_s8  }
   0x9   : > { %p802_p5 = por %p190_p2, %p189_p0  ;;  %p806_p6 = por %p196_p4, %p195_p3 }
   0xa   : > { %p550_p7 = scmp.ge.s32.totalorder %s714_s27, 1  ;;  %p239_p8 = scmp.lt.s32.totalorder %s714_s27, 3 }
   0xc   : > { %p240_p9 = pnand %p550_p7, %p239_p8 }
   0xd   : > { %p270_p10 = scmp.lt.s32.totalorder (!%p240_p9), %s785_s28, 1  ;;  %v716_v0 = vmov (!%p240_p9), 0.0|0.0   ;;  %v360_v1 = vld [vmem:[%s895_s2] sm:$0xff] (!%p240_p9)  ;;  %vm717_vm0 = vmmov (!%p240_p9), 0   ;;  %v718_v2 = vmov (!%p240_p9), 0.0   ;;  %v719_v3 = vmov (!%p240_p9), 0  }
   0xe   : > { %243 = sbr.rel (%p240_p9) target bundleno = 722 (0x2d2), region = 48  ;;  %596 = vmatprep.subr.bf16.mxu0 (!%p240_p9), %v716_v0  ;;  %600 = vmatprep.subr.bf16.mxu1 (!%p240_p9), %v716_v0  ;;  %v367_v4 = vld [vmem:[%s896_s3] sm:$0xff] (!%p240_p9)  ;;  %s720_s22 = smov (!%p240_p9), 1   ;;  %v275_v6 = vlaneseq (!%p240_p9)  ;;  %vm722_vm2 = vmmov (!%p240_p9), 1   ;;  %vm286_vm5 = vcmask (!%p240_p9), 195584  }
   0xf   : > { %584 = vmatprep.mubr.msk.f32.mxu0 (!%p240_p9), %vm717_vm0, %v718_v2  ;;  %650 = vset.pattern.permute.xlu1 (!%p240_p9), %v719_v3  ;;  %s721_s23 = smov (!%p240_p9), 127   ;;  %v285_v11 = vld [vmem:[%s894_s1] sm:$0xff] (!%p240_p9)  ;;  %s267_s18 = sand.u32 (!%p240_p9), 1, %s706_s25  }
  0x10   : > { %363 = vperm.xlu1 (!%p240_p9), %650, %v360_v1   ;;  %593 = vmatprep.mubr.msk.f32.mxu1 (!%p240_p9), %vm717_vm0, %v718_v2  ;;  %v276_v7 = vand.u32 (!%p240_p9), 127, %v275_v6  ;;  %v464_v20 = vld [vmem:[%s899_s6] sm:$0xff] (!%p240_p9)  ;;  %s551_s19 = sshll.u32 (!%p240_p9), %s267_s18, 3  ;;  %s565_s20 = sshll.u32 (!%p240_p9), %s785_s28, 7 }
  0x11   : > { %651 = vset.pattern.permute.xlu0 (!%p240_p9), %v719_v3  ;;  %v457_v21 = vld [vmem:[%s898_s5] sm:$0xff] (!%p240_p9)  ;;  %s850_s8 = scalar_lea.hbm (!%p240_p9), %s900_s7, %s565_s20  ;;  %s475_s9 = scalar_lea.sflag (!%p240_p9), [#allocation3], %s267_s18 }
  0x12   : > { %vm568_vm1 = vcmp.ne.s32.totalorder (!%p240_p9), %v276_v7, 0  ;;  %vm569_vm4 = vcmp.ne.s32.totalorder (!%p240_p9), %v276_v7, 127  ;;  %vm375_vm6 = vcmp.lt.s32.totalorder (!%p240_p9), %v276_v7, 16  ;;  %v383_v24 = vld [vmem:[%s897_s4] sm:$0xff] (!%p240_p9) }
  0x13   : > { %vm598_vm3 = vmpackc.low (!%p240_p9), %vm722_vm2, %vm568_vm1 }
  0x14   : > { %370 = vperm.xlu1 (!%p240_p9), %650, %v367_v4   ;;  %vm602_vm7 = vmpackc.low (!%p240_p9), %vm375_vm6, %vm568_vm1 }
  0x15   : > { %s271_s15 = scalar_select %p270_p10, %s785_s28, 1 }
  0x16   : > { %s723_s28 = smov [#allocation2]  }
  0x17   : > { %s552_s16 = sshll.u32 %s271_s15, 3  ;;  %s656_s14 = sshll.u32 %s723_s28, 4  ;;  %s657_s14 = int_to_ptr.vmem [resolvable:$false] %s656_s14 }
  0x18   : > { %s273_s21 = scalar_lea.vmem %s893_s0, %s552_s16  ;;  %s658_s15 = scalar_lea.vmem %s657_s14, 256 }
  0x19   : > { %v274_v5 = vld [vmem:[%s273_s21] sm:$0xff]  ;;  %s269_s21 = scalar_lea.vmem [#allocation2], %s551_s19 }
  0x1a   : > { %278 = vrot.lane.b32.xlu0 %v274_v5, %s720_s22 }
  0x1e   : > { %282 = vrot.lane.b32.xlu0 %v274_v5, %s721_s23 }
  0x8c   : > { %v279_v8 = vpop.permute.xlu0 %278 }
  0x8d   : > { %v597_v9 = vpack.c.bf16 %v274_v5, %v279_v8 }
  0x8f   : > { %599 = vmatpush3.bf16.msk.msra.mxu0 %vm598_vm3, %v597_v9  ;;  %v364_v12 = vpop.permute.xlu1 %363 }
  0x90   : > { %582 = vmatprep.subr.mxu0 %v718_v2  ;;  %v283_v10 = vpop.permute.xlu0 %282 }
  0x93   : > { %583 = vmatpush3.msk.msra.mxu0 %vm569_vm4, %v283_v10  ;;  %v371_v16 = vpop.permute.xlu1 %370 }
  0x94   : > { %585 = vmatmul.mubr.msk.f32.vlgmr.msra.gmra.mrb[0].mxu0 %vm286_vm5, %v285_v11 }
 0x167   : > { %v356_v13 = vpop.f32.mrb[0].mxu0 }
 0x168   : > { %v366_v14 = vmul.f32 %v364_v12, %v356_v13  ;;  %v586_v15 = vpop.f32.mrb[1].mxu0 }
 0x16a   : > { %v373_v17 = vadd.f32 %v371_v16, %v366_v14 }
 0x16c   : > { %v374_v18 = vmax.f32 %v373_v17, 0.0 }
 0x16e   : > { %v376_v19 = vsel %vm375_vm6, %v374_v18, 0.0 }
 0x16f   : > { %380 = vrot.lane.b32.xlu1 %v376_v19, %s721_s23  ;;  %377 = vrot.lane.b32.xlu0 %v376_v19, %s720_s22  ;;  %s488_s22 = sshll.u32 %s269_s21, 4  ;;  %s852_s22 = int_to_ptr.vmem [resolvable:$true] %s488_s22 }
 0x170   : > { %s652_s13 = scalar_lea.vmem %s852_s22, 128  ;;  %p659_p0 = scmp.lt.s32.totalorder %s852_s22, %s657_s14 }
 0x171   : > { %p653_p11 = scmp.ne.s32.totalorder %s852_s22, %s652_s13  ;;  %p660_p1 = scmp.lt.s32.totalorder %s658_s15, %s652_s13 }
 0x173   : > { %467 = vperm.xlu1 %650, %v464_v20   ;;  %460 = vperm.xlu0 %651, %v457_v21   ;;  %p654_p12 = pnand %p653_p11, %p802_p5  ;;  %p661_p2 = por %p660_p1, %p659_p0 }
 0x175   : > { %p655_p13 = pneg %p654_p12 }
 0x177   : > { %p662_p3 = pnand %p661_p2, %p655_p13 }
 0x1e1   : > { %v378_v22 = vpop.permute.xlu0 %377  ;;  %v381_v25 = vpop.permute.xlu1 %380 }
 0x1e2   : > { %v601_v23 = vpack.c.bf16 %v374_v18, %v378_v22 }
 0x1e4   : > { %603 = vmatpush3.bf16.msk.msra.mxu1 %vm602_vm7, %v601_v23 }
 0x1e5   : > { %591 = vmatprep.subr.mxu1 %v718_v2 }
 0x1e8   : > { %592 = vmatpush3.msk.msra.mxu1 %vm569_vm4, %v381_v25 }
 0x1e9   : > { %594 = vmatmul.mubr.msk.f32.vlgmr.msra.gmra.mrb[0].mxu1 %vm286_vm5, %v383_v24 }
 0x1f2   : > { %v461_v26 = vpop.permute.xlu0 %460  ;;  %v468_v30 = vpop.permute.xlu1 %467 }
 0x2bc   : > { %v453_v27 = vpop.f32.mrb[0].mxu1 }
 0x2bd   : > { %v463_v28 = vmul.f32 %v461_v26, %v453_v27  ;;  %v595_v29 = vpop.f32.mrb[1].mxu1 }
 0x2bf   : > { %v470_v31 = vadd.f32 %v468_v30, %v463_v28 }
 0x2c1   : > { %v471_v32 = vmax.f32 %v470_v31, 0.0 }
 0x2c3   : > { %v472_v33 = vsel %vm375_vm6, %v471_v32, 0.0 }
 0x2c4   : > { %473 = vst [vmem:[%s269_s21] sm:$0xff] %v472_v33 }
 0x2c5   : > { %665 = shalt.err (!%p662_p3)
}
 0x2c6   : > { %s666_s16 = scalar_lea.hbm %s850_s8, 128  ;;  %s670_s19 = scalar_lea.hbm %s900_s7, 256 }
 0x2c7   : > { %p667_p4 = scmp.ne.s32.totalorder %s850_s8, %s666_s16  ;;  %p671_p9 = scmp.lt.u32.totalorder %s850_s8, %s900_s7 }
 0x2c8   : > { %p672_p10 = scmp.lt.u32.totalorder %s670_s19, %s666_s16  ;;  %p674_p12 = scmp.lt.u32.totalorder %s666_s16, %s850_s8 }
 0x2c9   : > { %p668_p7 = pnand %p667_p4, %p802_p5 }
 0x2ca   : > { %p673_p11 = por %p672_p10, %p671_p9 }
 0x2cb   : > { %p669_p8 = pneg %p668_p7 }
 0x2cc   : > { %p675_p13 = por %p674_p12, %p673_p11 }
 0x2ce   : > { %p676_p0 = pnand %p675_p13, %p669_p8 }
 0x2d0   : > { %679 = shalt.err (!%p676_p0)
}
 0x2d1   : > { %604 = dma.vmem_to_hbm [thread:$0]  (%p802_p5), %s852_s22, 128, %s850_s8, %s475_s9  }
 0x2d2 PF: > { %p610_p1 = scmp.ge.s32.totalorder %s714_s27, 2  ;;  %s500_s23 = sand.u32 1, %s702_s24  }
 0x2d3   : > { %s501_s29 = scalar_lea.sflag [#allocation3], %s500_s23 }
 0x2d4   : > { %p607_p2 = pnand %p610_p1, %p806_p6 }
 0x2d6   : > { %697 = dma.done.wait (!%p607_p2), %s501_s29, 128  }
 0x2d7   : > { %699 = vsyncadd (!%p607_p2), %s501_s29, 4294967168  ;;  %p17_p3 = scmp.ge.s32.totalorder %s789_s30, 4   ;;  %s903_s24 = smov %s706_s25 }
 0x2d8   : > { %s904_s25 = smov %s710_s26  ;;  %s905_s26 = smov %s800_s10 }
 0x2d9   : > { %s906_s27 = smov %s789_s30  ;;  %19 = sbr.rel (!%p17_p3) target bundleno = 3 (0x3), region = 83 }
 0x2e0   :  { %506 = vsyncpa [#allocation3], 1 }
 0x2e1   :  { %508 = vsyncpa [#allocation3 + $0x1], 1 }

</bundles_post_ra>
